<compile_context>
chip_gen: v7x
topology: tpu7x:2x2x1
jax: 0.10.0
libtpu: 0.0.40
codegen_flags: <defaults>
</compile_context>

<pallas_src>
import functools

import numpy as np
import jax
import jax.numpy as jnp
from jax.experimental import pallas as pl
from jax.experimental.pallas import tpu as pltpu

_EPS = 1e-5


def _round_up(x, m):
    return (x + m - 1) // m * m


def _accumulate_stats(v, stats_ref):
    """Accumulate per-channel sum / sum-of-squares of v (C, T) into stats_ref (C, 2).

    Lane reductions are matmuls against a ones vector so they run on the
    (otherwise idle) MXU, keeping the XLU free for the depthwise-conv rolls.
    """
    ones = jnp.ones((v.shape[1], 1), jnp.float32)
    s = jnp.dot(v, ones, preferred_element_type=jnp.float32)        # (C, 1)
    q = jnp.dot(v * v, ones, preferred_element_type=jnp.float32)    # (C, 1)

    @pl.when(pl.program_id(0) == 0)
    def _():
        stats_ref[...] = jnp.zeros_like(stats_ref)

    stats_ref[:, 0:1] += s
    stats_ref[:, 1:2] += q


def _mbconv_stage_kernel(x_ref, w1_ref, *rest, stage, stride, use_residual,
                         compute_dtype):
    """Fused MBConv chain, truncated at `stage` (see module docstring)."""
    x = x_ref[...]                                                  # (Cin, T) f32

    # ---- conv1 (1x1 pointwise): one MXU matmul over the lane tile ----------
    y = jnp.dot(w1_ref[...].astype(compute_dtype), x.astype(compute_dtype),
                preferred_element_type=jnp.float32)                 # (H, T) f32
    if stage == 1:
        _accumulate_stats(y, rest[-1])
        return

    a1_ref, w2_ref, mask_ref = rest[0], rest[1], rest[2]
    a1 = a1_ref[...]                                                # (H, 2)
    y = jnp.maximum(y * a1[:, 0:1] + a1[:, 1:2], 0.0)               # BN1 + ReLU

    # ---- conv2 (depthwise k=3, pad=1): XLU rotations + precomputed masks ---
    mask = mask_ref[...]                                            # (2, T)
    left = mask[0:1, :] * pltpu.roll(y, 1, axis=1)                  # y[p-1]
    right = mask[1:2, :] * pltpu.roll(y, y.shape[1] - 1, axis=1)    # y[p+1]
    w2 = w2_ref[...]                                                # (H, 3)
    z = w2[:, 1:2] * y + w2[:, 0:1] * left + w2[:, 2:3] * right
    if stride > 1:
        # Whole-sequence tiles with l_in % stride == 0 -> one global strided
        # slice (checked in the wrapper).
        z = z[:, ::stride]
    if stage == 2:
        _accumulate_stats(z, rest[-1])
        return

    a2_ref, w3_ref = rest[3], rest[4]
    a2 = a2_ref[...]
    z = jnp.maximum(z * a2[:, 0:1] + a2[:, 1:2], 0.0)               # BN2 + ReLU

    # ---- conv3 (1x1 pointwise) ----------------------------------------------
    o = jnp.dot(w3_ref[...].astype(compute_dtype), z.astype(compute_dtype),
                preferred_element_type=jnp.float32)                 # (Cout, T')
    if stage == 3:
        _accumulate_stats(o, rest[-1])
        return

    a3_ref, o_ref = rest[5], rest[6]
    a3 = a3_ref[...]
    o = o * a3[:, 0:1] + a3[:, 1:2]                                 # BN3
    if use_residual:
        o = o + x
    o_ref[...] = o.astype(o_ref.dtype)                              # lane-dense store


def _fold_bn(stats, gamma, beta, count, eps=_EPS):
    """Fold single-pass batch statistics into per-channel (scale, shift)."""
    mean = stats[:, 0] / count
    var = jnp.maximum(stats[:, 1] / count - mean * mean, 0.0)  # guard cancellation
    scale = jax.lax.rsqrt(var + eps) * gamma
    shift = beta - mean * scale
    return jnp.stack([scale, shift], axis=1).astype(jnp.float32)    # (C, 2)


def _choose_tile_batch(n, l_in, l_out, target_cols):
    """Whole-sequence lane tiles: sequences per tile so that input and output
    tile columns are multiples of 128 and <= target_cols; else single tile."""
    if n * l_in <= target_cols:
        return n
    cands = [tb for tb in range(1, n + 1)
             if n % tb == 0 and tb * l_in <= target_cols
             and (tb * l_in) % 128 == 0 and (tb * l_out) % 128 == 0]
    return max(cands) if cands else n


def _vmem_limit_bytes():
    # v5e/v6e: 128 MiB physical VMEM; v7x: 64 MiB.  Leave compiler headroom.
    try:
        cap = pltpu.get_tpu_info().vmem_capacity_bytes
    except Exception:
        cap = 64 * 1024 * 1024
    return int(min(cap * 3 // 4, 100 * 1024 * 1024))


def mbconv_forward(x, params, *, stride, use_residual,
                   compute_dtype=jnp.float32, target_tile_cols=2048):
    n, c_in, l_in = x.shape
    c_hidden = params["w1"].shape[0]
    c_out = params["w3"].shape[0]
    l_out = (l_in - 1) // stride + 1
    if stride > 1 and l_in % stride != 0:
        # TODO(synk): general stride decimation (l_in % stride != 0) needs a
        # per-sequence gather; not implemented.
        raise NotImplementedError("stride > 1 requires l_in % stride == 0")

    f32 = jnp.float32
    # ---- pad channel dims to full f32 sublanes (multiples of 8) -------------
    cin_p, ch_p, cout_p = (_round_up(c, 8) for c in (c_in, c_hidden, c_out))
    w1 = jnp.zeros((ch_p, cin_p), f32).at[:c_hidden, :c_in].set(params["w1"])
    w2 = jnp.zeros((ch_p, 3), f32).at[:c_hidden, :].set(params["w2"])
    w3 = jnp.zeros((cout_p, ch_p), f32).at[:c_out, :c_hidden].set(params["w3"])

    def _pad_gb(g, b, cp):
        gp = jnp.ones((cp,), f32).at[:g.shape[0]].set(g)
        bp = jnp.zeros((cp,), f32).at[:b.shape[0]].set(b)
        return gp, bp

    g1, be1 = _pad_gb(params["g1"], params["be1"], ch_p)
    g2, be2 = _pad_gb(params["g2"], params["be2"], ch_p)
    g3, be3 = _pad_gb(params["g3"], params["be3"], cout_p)

    # ---- layout plumbing: flatten batch into the lane dimension -------------
    x_p = jnp.zeros((n, cin_p, l_in), f32).at[:, :c_in, :].set(x)
    x_flat = jnp.transpose(x_p, (1, 0, 2)).reshape(cin_p, n * l_in)

    # ---- lane tiling (whole sequences per tile -> no dwconv halo) ------------
    tile_b = _choose_tile_batch(n, l_in, l_out, target_tile_cols)
    num_tiles = n // tile_b
    t_in, t_out = tile_b * l_in, tile_b * l_out

    pos = np.arange(t_in) % l_in
    masks = jnp.asarray(np.stack([(pos != 0), (pos != l_in - 1)])
                        .astype(np.float32))                        # (2, t_in)

    x_spec = pl.BlockSpec((cin_p, t_in), lambda t: (0, t))

    def const_spec(a):
        return pl.BlockSpec(a.shape, lambda t: (0, 0))

    vmem_limit = _vmem_limit_bytes()

    def run_stage(stage, args, out_shape, out_spec, semantics):
        kernel = functools.partial(
            _mbconv_stage_kernel, stage=stage, stride=stride,
            use_residual=use_residual, compute_dtype=compute_dtype)
        return pl.pallas_call(
            kernel,
            grid=(num_tiles,),
            in_specs=[x_spec] + [const_spec(a) for a in args[1:]],
            out_specs=out_spec,
            out_shape=out_shape,
            compiler_params=pltpu.CompilerParams(
                dimension_semantics=(semantics,),
                vmem_limit_bytes=vmem_limit),
        )(*args)

    def stats_shape(c):
        return jax.ShapeDtypeStruct((c, 2), f32)

    def stats_spec(c):
        return pl.BlockSpec((c, 2), lambda t: (0, 0))   # resident accumulator

    # pass 1: BN1 statistics (stats accumulate -> "arbitrary" tile axis)
    st1 = run_stage(1, (x_flat, w1), stats_shape(ch_p), stats_spec(ch_p),
                    "arbitrary")
    a1 = _fold_bn(st1, g1, be1, n * l_in)
    # pass 2: BN2 statistics
    st2 = run_stage(2, (x_flat, w1, a1, w2, masks), stats_shape(ch_p),
                    stats_spec(ch_p), "arbitrary")
    a2 = _fold_bn(st2, g2, be2, n * l_out)
    # pass 3: BN3 statistics
    st3 = run_stage(3, (x_flat, w1, a1, w2, masks, a2, w3),
                    stats_shape(cout_p), stats_spec(cout_p), "arbitrary")
    a3 = _fold_bn(st3, g3, be3, n * l_out)
    # pass 4: normalize + residual, independent tiles -> "parallel" (megacore)
    out_flat = run_stage(
        4, (x_flat, w1, a1, w2, masks, a2, w3, a3),
        jax.ShapeDtypeStruct((cout_p, n * l_out), x.dtype),
        pl.BlockSpec((cout_p, t_out), lambda t: (0, t)), "parallel")

    out = jnp.transpose(out_flat.reshape(cout_p, n, l_out), (1, 0, 2))
    return out[:, :c_out, :]


def mbconv_reference(x, p, *, stride, use_residual,
                     compute_dtype=jnp.float32, eps=_EPS):
    """Plain-JAX reference matching PyTorch MBConv.forward in train mode
    (keeps the conv biases that the kernel drops -- they cancel in batch BN).
    `compute_dtype` optionally rounds the pointwise-matmul operands (bf16
    path) exactly like the kernel does, keeping accumulation in f32."""
    f32 = jnp.float32

    def bn(y, g, b):
        mean = y.mean(axis=(0, 2), keepdims=True)
        var = ((y - mean) ** 2).mean(axis=(0, 2), keepdims=True)
        return (y - mean) / jnp.sqrt(var + eps) * g.reshape(1, -1, 1) \
            + b.reshape(1, -1, 1)

    cd = compute_dtype
    l_in = x.shape[2]
    l_out = (l_in - 1) // stride + 1

    y = jnp.einsum("hc,ncl->nhl", p["w1"].astype(cd), x.astype(cd),
                   preferred_element_type=f32) + p["b1"].reshape(1, -1, 1)
    y = jax.nn.relu(bn(y, p["g1"], p["be1"]))

    yp = jnp.pad(y, ((0, 0), (0, 0), (1, 1)))
    z = p["b2"].reshape(1, -1, 1)
    for k in range(3):
        z = z + p["w2"][:, k].reshape(1, -1, 1) * \
            yp[:, :, k:k + (l_out - 1) * stride + 1:stride]
    z = jax.nn.relu(bn(z, p["g2"], p["be2"]))

    o = jnp.einsum("oh,nhl->nol", p["w3"].astype(cd), z.astype(cd),
                   preferred_element_type=f32) + p["b3"].reshape(1, -1, 1)
    o = bn(o, p["g3"], p["be3"])
    if use_residual:
        o = o + x
    return o


def init_params(key, in_channels, out_channels, expansion_factor):
    hidden = int(in_channels * expansion_factor)
    ks = jax.random.split(key, 6)
    f32 = jnp.float32
    return {
        # conv1: (hidden, in, 1) -> squeeze kernel dim
        "w1": 0.1 * jax.random.normal(ks[0], (hidden, in_channels), f32),
        "b1": 0.1 * jax.random.normal(ks[1], (hidden,), f32),
        "g1": jnp.ones((hidden,), f32), "be1": jnp.zeros((hidden,), f32),
        # conv2 (depthwise): (hidden, 1, 3) -> (hidden, 3)
        "w2": 0.1 * jax.random.normal(ks[2], (hidden, 3), f32),
        "b2": 0.1 * jax.random.normal(ks[3], (hidden,), f32),
        "g2": jnp.ones((hidden,), f32), "be2": jnp.zeros((hidden,), f32),
        # conv3: (out, hidden, 1) -> (out, hidden)
        "w3": 0.1 * jax.random.normal(ks[4], (out_channels, hidden), f32),
        "b3": 0.1 * jax.random.normal(ks[5], (out_channels,), f32),
        "g3": jnp.ones((out_channels,), f32),
        "be3": jnp.zeros((out_channels,), f32),
    }


if __name__ == "__main__":
    key = jax.random.PRNGKey(0)

    def run_case(idx, *, n, l, c_in, c_out, expansion, stride,
                 compute_dtype, target_tile_cols, tol):
        use_residual = (c_in == c_out) and (stride == 1)
        kx, kp = jax.random.split(jax.random.fold_in(key, idx))
        x = jax.random.normal(kx, (n, c_in, l), jnp.float32)
        params = init_params(kp, c_in, c_out, expansion)
        out = mbconv_forward(x, params, stride=stride,
                             use_residual=use_residual,
                             compute_dtype=compute_dtype,
                             target_tile_cols=target_tile_cols)
        out = jax.block_until_ready(out)
        ref = mbconv_reference(x, params, stride=stride,
                               use_residual=use_residual,
                               compute_dtype=compute_dtype)
        assert out.shape == ref.shape, (out.shape, ref.shape)
        err = float(jnp.max(jnp.abs(out - ref)))
        assert err <= tol, ("case", idx, "max_abs_err", err)

    # Case 0: small demo shape (single lane tile), f32 matmul operands.
    run_case(0, n=2, l=64, c_in=4, c_out=4, expansion=4, stride=1,
             compute_dtype=jnp.float32, target_tile_cols=2048, tol=2e-4)
    # Case 1: multi-tile pipelined grid (4 whole-sequence tiles of 512 lanes).
    run_case(1, n=16, l=128, c_in=8, c_out=8, expansion=4, stride=1,
             compute_dtype=jnp.float32, target_tile_cols=512, tol=5e-4)
    # Case 2: bf16 MXU operands (v6e/v7x path); BN / elementwise stays f32.
    run_case(2, n=2, l=64, c_in=4, c_out=4, expansion=4, stride=1,
             compute_dtype=jnp.bfloat16, target_tile_cols=2048, tol=5e-3)

    print("KERNEL_OK")
</pallas_src>

<mosaic_0001>
module attributes {stable_mosaic.version = 11 : i64} {
  func.func @_mbconv_stage_kernel(%arg0: i32, %arg1: memref<8x128xf32, #tpu.memory_space<vmem>>, %arg2: memref<16x8xf32, #tpu.memory_space<vmem>>, %arg3: memref<16x2xf32, #tpu.memory_space<vmem>>) attributes {dimension_semantics = [#tpu.dimension_semantics<arbitrary>], iteration_bounds = array<i64: 1>, scalar_prefetch = 0 : i64, scratch_operands = 0 : i64, tpu.core_type = #tpu.core_type<tc>, window_params = [{transform_indices = @transform_0, window_bounds = array<i64: 8, 128>}, {pipeline_mode = #tpu.pipeline_mode<synchronous>, transform_indices = @transform_1, window_bounds = array<i64: 16, 8>}, {pipeline_mode = #tpu.pipeline_mode<synchronous>, transform_indices = @transform_2, window_bounds = array<i64: 16, 2>}]} {
    %c0 = arith.constant 0 : index
    %c0_0 = arith.constant 0 : index
    %0 = vector.load %arg1[%c0, %c0_0] : memref<8x128xf32, #tpu.memory_space<vmem>>, vector<8x128xf32>
    %c0_1 = arith.constant 0 : index
    %c0_2 = arith.constant 0 : index
    %1 = vector.load %arg2[%c0_1, %c0_2] : memref<16x8xf32, #tpu.memory_space<vmem>>, vector<16x8xf32>
    %cst = arith.constant dense<0.000000e+00> : vector<16x128xf32>
    %2 = tpu.matmul %1, %0, %cst {dimension_numbers = #tpu.dot_dimension_numbers<[1], [0], [0], [1], [0, 0, 1, 1], [], []>} : vector<16x8xf32>, vector<8x128xf32>, vector<16x128xf32> -> vector<16x128xf32>
    %cst_3 = arith.constant 1.000000e+00 : f32
    %3 = vector.broadcast %cst_3 : f32 to vector<128x1xf32>
    %cst_4 = arith.constant dense<0.000000e+00> : vector<16x1xf32>
    %4 = tpu.matmul %2, %3, %cst_4 {dimension_numbers = #tpu.dot_dimension_numbers<[1], [0], [0], [1], [0, 0, 1, 1], [], []>} : vector<16x128xf32>, vector<128x1xf32>, vector<16x1xf32> -> vector<16x1xf32>
    %5 = arith.mulf %2, %2 : vector<16x128xf32>
    %cst_5 = arith.constant dense<0.000000e+00> : vector<16x1xf32>
    %6 = tpu.matmul %5, %3, %cst_5 {dimension_numbers = #tpu.dot_dimension_numbers<[1], [0], [0], [1], [0, 0, 1, 1], [], []>} : vector<16x128xf32>, vector<128x1xf32>, vector<16x1xf32> -> vector<16x1xf32>
    %c0_i32 = arith.constant 0 : i32
    %7 = arith.cmpi eq, %arg0, %c0_i32 : i32
    %8 = arith.extui %7 : i1 to i32
    %c0_i32_6 = arith.constant 0 : i32
    %9 = arith.cmpi ne, %8, %c0_i32_6 : i32
    scf.if %9 {
      %cst_14 = arith.constant 0.000000e+00 : f32
      %16 = vector.broadcast %cst_14 : f32 to vector<16x2xf32>
      %c0_15 = arith.constant 0 : index
      %c0_16 = arith.constant 0 : index
      %17 = vector.load %arg3[%c0_15, %c0_16] : memref<16x2xf32, #tpu.memory_space<vmem>>, vector<16x2xf32>
      tpu.vector_store %arg3[%c0_15, %c0_16], %16 {strides = array<i32>} : memref<16x2xf32, #tpu.memory_space<vmem>>, vector<16x2xf32>,
    } else {
    }
    %c0_7 = arith.constant 0 : index
    %c0_8 = arith.constant 0 : index
    %10 = vector.load %arg3[%c0_7, %c0_8] : memref<16x2xf32, #tpu.memory_space<vmem>>, vector<16x1xf32>
    %11 = arith.addf %10, %4 : vector<16x1xf32>
    %c0_9 = arith.constant 0 : index
    %c0_10 = arith.constant 0 : index
    %12 = vector.load %arg3[%c0_9, %c0_10] : memref<16x2xf32, #tpu.memory_space<vmem>>, vector<16x1xf32>
    tpu.vector_store %arg3[%c0_9, %c0_10], %11 {strides = array<i32>} : memref<16x2xf32, #tpu.memory_space<vmem>>, vector<16x1xf32>,
    %c0_11 = arith.constant 0 : index
    %c1 = arith.constant 1 : index
    %13 = vector.load %arg3[%c0_11, %c1] : memref<16x2xf32, #tpu.memory_space<vmem>>, vector<16x1xf32>
    %14 = arith.addf %13, %6 : vector<16x1xf32>
    %c0_12 = arith.constant 0 : index
    %c1_13 = arith.constant 1 : index
    %15 = vector.load %arg3[%c0_12, %c1_13] : memref<16x2xf32, #tpu.memory_space<vmem>>, vector<16x1xf32>
    tpu.vector_store %arg3[%c0_12, %c1_13], %14 {strides = array<i32>} : memref<16x2xf32, #tpu.memory_space<vmem>>, vector<16x1xf32>,
    return
  }
  func.func @transform_0(%arg0: i32) -> (i32, i32) {
    %c0_i32 = arith.constant 0 : i32
    %c0_i32_0 = arith.constant 0 : i32
    return %c0_i32, %arg0 : i32, i32
  }
  func.func @transform_1(%arg0: i32) -> (i32, i32) {
    %c0_i32 = arith.constant 0 : i32
    %c0_i32_0 = arith.constant 0 : i32
    %c0_i32_1 = arith.constant 0 : i32
    return %c0_i32, %c0_i32_0 : i32, i32
  }
  func.func @transform_2(%arg0: i32) -> (i32, i32) {
    %c0_i32 = arith.constant 0 : i32
    %c0_i32_0 = arith.constant 0 : i32
    %c0_i32_1 = arith.constant 0 : i32
    return %c0_i32, %c0_i32_0 : i32, i32
  }
}

</mosaic_0001>

<bundles_post_ra>
// kernel: tpu_custom_call.1
= control target key start
LH: loop header
LB: loop body
LE: loop exit
PB: predicated region body
PF: predicated region fallthrough
CT: control target
= control target key end

     0   :  { %vm14_vm0 = vcmask 64512   ;;  %v432_v3 = vmov 1.0|1.0   ;;  %vm252_vm1 = vcmask 15360   ;;  %v433_v8 = vmov 0.0   ;;  %s434_s25 = smov 1   ;;  %s489_s0 = inlined_call_operand.vmem [shape: f32[8,128], index: 0, kind: input, shape index: {}]   ;;  %s490_s1 = inlined_call_operand.vmem [shape: f32[16,8], index: 1, kind: input, shape index: {}]   ;;  %s491_s2 = inlined_call_operand.vmem [shape: f32[16,2], index: 2, kind: output, shape index: {}]  }
   0x1   :  { %v11_v0 = vld [vmem:[%s489_s0] sm:$0xff]  ;;  %v13_v2 = vld [vmem:[%s490_s1 + $0x8] sm:$0xff]  ;;  %397 = vmatprep.subr.bf16.mxu1 %v432_v3  ;;  %254 = vst.msk [vmem:[%s491_s2 + $0x8] sm:$0xff] %vm252_vm1, %v433_v8  ;;  %253 = vst.msk [vmem:[%s491_s2] sm:$0xff] %vm252_vm1, %v433_v8  ;;  %vm259_vm2 = vcmask 7168   ;;  %vm274_vm3 = vcmask 15368  }
   0x2   :  { %v12_v1 = vld [vmem:[%s490_s1] sm:$0xff]  ;;  %322 = vmatprep.subr.mxu0 %v11_v0  ;;  %398 = vmatpush3.bf16.msra.mxu1 %v432_v3 }
   0x3   :  { %324 = vmatprep.mubr.msk.f32.mxu0 %vm14_vm0, %v12_v1  ;;  %323 = vmatpush3.msra.mxu0 %v11_v0 }
   0x4   :  { %325 = vmatmul.mubr.msk.f32.vlgmr.msra.gmra.mrb[0].mxu0 %vm14_vm0, %v13_v2  ;;  %413 = vmatprep.subr.bf16.mxu0 %v432_v3 }
   0x5   :  { %414 = vmatpush3.bf16.msra.mxu0 %v432_v3  ;;  %399 = vmatprep.subr.bf16.mxu1 %v432_v3 }
   0x6   :  { %415 = vmatprep.subr.bf16.mxu0 %v432_v3  ;;  %400 = vmatpush3.bf16.msra.mxu1 %v432_v3 }
   0x7   :  { %401 = vmatprep.subr.bf16.mxu1 %v432_v3 }
   0x8   :  { %v256_v9 = vld [vmem:[%s491_s2 + $0x8] sm:$0xff]  ;;  %v255_v10 = vld [vmem:[%s491_s2] sm:$0xff] }
   0x9   :  { %416 = vmatpush3.bf16.msra.mxu0 %v432_v3 }
   0xa   :  { %417 = vmatprep.subr.bf16.mxu0 %v432_v3  ;;  %402 = vmatpush3.bf16.msra.mxu1 %v432_v3 }
   0xb   :  { %403 = vmatprep.subr.bf16.mxu1 %v432_v3 }
   0xd   :  { %418 = vmatpush3.bf16.msra.mxu0 %v432_v3 }
   0xe   :  { %419 = vmatprep.subr.bf16.mxu0 %v432_v3  ;;  %404 = vmatpush3.bf16.msra.mxu1 %v432_v3 }
   0xf   :  { %405 = vmatprep.subr.bf16.mxu1 %v432_v3 }
  0x11   :  { %420 = vmatpush3.bf16.msra.mxu0 %v432_v3 }
  0x12   :  { %421 = vmatprep.subr.bf16.mxu0 %v432_v3  ;;  %406 = vmatpush3.bf16.msra.mxu1 %v432_v3 }
  0x13   :  { %407 = vmatprep.subr.bf16.mxu1 %v432_v3 }
  0x15   :  { %422 = vmatpush3.bf16.msra.mxu0 %v432_v3 }
  0x16   :  { %423 = vmatprep.subr.bf16.mxu0 %v432_v3  ;;  %408 = vmatpush3.bf16.msra.mxu1 %v432_v3 }
  0x17   :  { %409 = vmatprep.subr.bf16.mxu1 %v432_v3 }
  0x19   :  { %424 = vmatpush3.bf16.msra.mxu0 %v432_v3 }
  0x1a   :  { %425 = vmatprep.subr.bf16.mxu0 %v432_v3  ;;  %410 = vmatpush3.bf16.msra.mxu1 %v432_v3 }
  0x1b   :  { %411 = vmatprep.subr.bf16.mxu1 %v432_v3 }
  0x1d   :  { %426 = vmatpush3.bf16.msra.mxu0 %v432_v3 }
  0x1e   :  { %427 = vmatprep.subr.bf16.mxu0 %v432_v3  ;;  %412 = vmatpush3.bf16.msra.mxu1 %v432_v3 }
  0x21   :  { %428 = vmatpush3.bf16.msra.mxu0 %v432_v3 }
  0xd7   :  { %v326_v4 = vpop.f32.mrb[0].mxu0 }
  0xd8   :  { %v87_v5 = vpop.f32.mrb[1].mxu0  ;;  %v172_v7 = vmul.f32 %v326_v4, %v326_v4 }
  0xd9   :  { %v171_v6 = vmul.f32 %v87_v5, %v87_v5  ;;  %359 = vmatprep.mubr.f32.mxu1 %v87_v5 }
  0xda   :  { %360 = vmatmul.mubr.f32.vlgmr.msra.gmra.mrb[0].mxu1 %v326_v4 }
  0xdb   :  { %394 = vmatprep.mubr.f32.mxu0 %v171_v6 }
  0xdc   :  { %395 = vmatmul.mubr.f32.vlgmr.msra.gmra.mrb[2].mxu0 %v172_v7 }
 0x1ad   :  { %v361_v11 = vpop.f32.mrb[0].mxu1 }
 0x1ae   :  { %v258_v12 = vadd.f32 %v361_v11, %v256_v9  ;;  %v162_v13 = vpop.f32.mrb[1].mxu1 }
 0x1af   :  { %v257_v14 = vadd.f32 %v255_v10, %v162_v13  ;;  %v396_v15 = vpop.f32.mrb[2].mxu0 }
 0x1b0   :  { %261 = vst.msk [vmem:[%s491_s2 + $0x8] sm:$0xff] %vm259_vm2, %v258_v12  ;;  %v239_v16 = vpop.f32.mrb[3].mxu0 }
 0x1b1   :  { %260 = vst.msk [vmem:[%s491_s2] sm:$0xff] %vm259_vm2, %v257_v14  ;;  %266 = vrot.lane.b32.xlu0 %v239_v16, %s434_s25 }
 0x1b5   :  { %268 = vrot.lane.b32.xlu0 %v396_v15, %s434_s25 }
 0x1b7   :  { %v263_v21 = vld [vmem:[%s491_s2 + $0x8] sm:$0xff] }
 0x1b8   :  { %v262_v18 = vld [vmem:[%s491_s2] sm:$0xff] }
 0x223   :  { %v267_v17 = vpop.permute.xlu0 %266 }
 0x224   :  { %v272_v19 = vadd.f32 %v267_v17, %v262_v18 }
 0x226   :  { %275 = vst.msk [vmem:[%s491_s2] sm:$0xff] %vm274_vm3, %v272_v19 }
 0x227   :  { %v269_v20 = vpop.permute.xlu0 %268 }
 0x228   :  { %v273_v22 = vadd.f32 %v269_v20, %v263_v21 }
 0x22a   :  { %276 = vst.msk [vmem:[%s491_s2 + $0x8] sm:$0xff] %vm274_vm3, %v273_v22 }

</bundles_post_ra>
